<compile_context>
chip_gen: v6e
topology: v6e:2x2x1
jax: 0.10.0
libtpu: 0.0.40
codegen_flags: <defaults>
</compile_context>

<pallas_src>
import functools

import jax
import jax.numpy as jnp
from jax.experimental import pallas as pl
from jax.experimental.pallas import tpu as pltpu

HIDDEN_PAD = 256   # 200 -> 256 (two clean 128-lane tiles)
OUT_PAD = 128      # 4   -> 128 (lane-aligned internal logits for the softmax reduction)
NEG_BIG = -1e30    # padded logit lanes -> exp() == 0 under log_softmax (f32 only)


def robustnet_kernel(x_ref, w1_ref, b1_ref, w2_ref, b2_ref, o_ref, *, dim_out):
    # x: (TB, Din) f32, w1: (Din, 256) bf16, b1: (1, 256) f32,
    # w2: (256, 128) bf16, b2: (1, 128) f32, o: (TB, dim_out) f32
    x = x_ref[...].astype(jnp.bfloat16)

    # fc1 + ReLU  (bf16 MXU matmul, f32 accumulation)
    h = jnp.dot(x, w1_ref[...], preferred_element_type=jnp.float32) + b1_ref[...]
    h = jnp.maximum(h, 0.0)

    # fc2 (padded hidden rows of w2 are zero -> exact)
    logits = (jnp.dot(h.astype(jnp.bfloat16), w2_ref[...],
                      preferred_element_type=jnp.float32) + b2_ref[...])

    # log_softmax over the lane axis; padded lanes carry -1e30 bias so they never win
    # the max and contribute exp() == 0 to the normalizer.  Only the first dim_out
    # lanes are written to the output (no padded HBM writeback, no wrapper slice).
    m = jnp.max(logits, axis=-1, keepdims=True)
    shifted = logits - m
    lse = jnp.log(jnp.sum(jnp.exp(shifted), axis=-1, keepdims=True))
    o_ref[...] = (shifted - lse)[:, :dim_out].astype(o_ref.dtype)


def robustnet_forward(x, w1p, b1p, w2p, b2p, dim_out, *, grid_steps=2):
    """x: (B, Din) f32; padded params from pack_params(); returns (B, dim_out) f32 log-probs.

    grid_steps=2 by default: keeps both v7x TensorCores fed while adding only one extra
    ~0.35 us grid step on single-TC chips (v5e/v6e).
    """
    B, din = x.shape
    hp = w1p.shape[1]
    op = w2p.shape[1]

    if grid_steps < 1 or B % grid_steps != 0 or (B // grid_steps) % 8 != 0:
        grid_steps = 1  # fall back to a single step
    tb = B // grid_steps
    assert B % tb == 0 and tb % 8 == 0, "batch tile must divide B and be a multiple of 8"

    # Advisory cost estimate so XLA can schedule/overlap this custom call.
    flops = 2 * B * (din * hp + hp * op)
    bytes_accessed = (x.size * x.dtype.itemsize
                      + w1p.size * 2 + w2p.size * 2
                      + b1p.size * 4 + b2p.size * 4
                      + B * dim_out * 4)
    cost = pl.CostEstimate(flops=flops,
                           transcendentals=B * op,
                           bytes_accessed=bytes_accessed)

    kernel = functools.partial(robustnet_kernel, dim_out=dim_out)

    out = pl.pallas_call(
        kernel,
        out_shape=jax.ShapeDtypeStruct((B, dim_out), jnp.float32),
        grid_spec=pltpu.PrefetchScalarGridSpec(
            num_scalar_prefetch=0,
            grid=(B // tb,),
            in_specs=[
                pl.BlockSpec((tb, din), lambda i: (i, 0)),   # x: tiled over batch
                pl.BlockSpec((din, hp), lambda i: (0, 0)),   # w1: VMEM-resident
                pl.BlockSpec((1, hp),   lambda i: (0, 0)),   # b1: VMEM-resident
                pl.BlockSpec((hp, op),  lambda i: (0, 0)),   # w2: VMEM-resident
                pl.BlockSpec((1, op),   lambda i: (0, 0)),   # b2: VMEM-resident
            ],
            # Last block dim equals the full array dim (dim_out), so the narrow block is legal.
            out_specs=pl.BlockSpec((tb, dim_out), lambda i: (i, 0)),
        ),
        compiler_params=pltpu.CompilerParams(
            dimension_semantics=("parallel",)),
        cost_estimate=cost,
    )(x, w1p, b1p, w2p, b2p)
    return out


def init_params(key, dim_in, hidden, dim_out):
    """Deterministic PyTorch-style Linear init: U(-1/sqrt(fan_in), 1/sqrt(fan_in)).
    Weights stored transposed vs. PyTorch, i.e. (in_features, out_features)."""
    k1, k2, k3, k4 = jax.random.split(key, 4)
    bound1 = 1.0 / jnp.sqrt(dim_in)
    bound2 = 1.0 / jnp.sqrt(hidden)
    w1 = jax.random.uniform(k1, (dim_in, hidden), jnp.float32, -bound1, bound1)
    b1 = jax.random.uniform(k2, (1, hidden), jnp.float32, -bound1, bound1)
    w2 = jax.random.uniform(k3, (hidden, dim_out), jnp.float32, -bound2, bound2)
    b2 = jax.random.uniform(k4, (1, dim_out), jnp.float32, -bound2, bound2)
    return w1, b1, w2, b2


def pack_params(w1, b1, w2, b2, hidden_pad=HIDDEN_PAD, out_pad=OUT_PAD):
    """Pad to lane-aligned shapes and cast weights to bf16 (biases stay f32)."""
    din, h = w1.shape
    o = w2.shape[1]
    w1p = jnp.zeros((din, hidden_pad), jnp.bfloat16).at[:, :h].set(w1.astype(jnp.bfloat16))
    b1p = jnp.zeros((1, hidden_pad), jnp.float32).at[:, :h].set(b1)
    w2p = jnp.zeros((hidden_pad, out_pad), jnp.bfloat16).at[:h, :o].set(w2.astype(jnp.bfloat16))
    b2p = jnp.full((1, out_pad), NEG_BIG, jnp.float32).at[:, :o].set(b2)
    return w1p, b1p, w2p, b2p


if __name__ == "__main__":
    # Small shapes consistent with the module: fc1 hidden = 200, dimOut = 4.
    B, DIM_IN, HIDDEN, DIM_OUT = 256, 512, 200, 4

    key = jax.random.PRNGKey(0)
    kx, kp = jax.random.split(key)
    x = jax.random.normal(kx, (B, DIM_IN), jnp.float32)

    w1, b1, w2, b2 = init_params(kp, DIM_IN, HIDDEN, DIM_OUT)
    w1p, b1p, w2p, b2p = pack_params(w1, b1, w2, b2)

    out = robustnet_forward(x, w1p, b1p, w2p, b2p, DIM_OUT, grid_steps=2)
    out = jax.block_until_ready(out)

    # Pure-JAX reference (dropout = identity at inference), using the same
    # bf16 weights + f32 accumulation as the kernel, on the unpadded shapes.
    h_ref = jnp.maximum(
        jnp.dot(x.astype(jnp.bfloat16), w1.astype(jnp.bfloat16),
                preferred_element_type=jnp.float32) + b1, 0.0)
    logits_ref = jnp.dot(h_ref.astype(jnp.bfloat16), w2.astype(jnp.bfloat16),
                         preferred_element_type=jnp.float32) + b2
    ref = jax.nn.log_softmax(logits_ref, axis=1)

    assert out.shape == (B, DIM_OUT)
    assert jnp.allclose(out, ref, atol=2e-3, rtol=2e-3), float(jnp.max(jnp.abs(out - ref)))

    print("KERNEL_OK")
</pallas_src>

<mosaic_0001>
module attributes {stable_mosaic.version = 11 : i64} {
  func.func @robustnet_kernel(%arg0: i32, %arg1: memref<128x512xf32, #tpu.memory_space<vmem>>, %arg2: memref<512x256xbf16, #tpu.memory_space<vmem>>, %arg3: memref<1x256xf32, #tpu.memory_space<vmem>>, %arg4: memref<256x128xbf16, #tpu.memory_space<vmem>>, %arg5: memref<1x128xf32, #tpu.memory_space<vmem>>, %arg6: memref<128x4xf32, #tpu.memory_space<vmem>>) attributes {dimension_semantics = [#tpu.dimension_semantics<parallel>], iteration_bounds = array<i64: 2>, scalar_prefetch = 0 : i64, scratch_operands = 0 : i64, tpu.core_type = #tpu.core_type<tc>, window_params = [{transform_indices = @transform_0, window_bounds = array<i64: 128, 512>}, {pipeline_mode = #tpu.pipeline_mode<synchronous>, transform_indices = @transform_1, window_bounds = array<i64: 512, 256>}, {pipeline_mode = #tpu.pipeline_mode<synchronous>, transform_indices = @transform_2, window_bounds = array<i64: 1, 256>}, {pipeline_mode = #tpu.pipeline_mode<synchronous>, transform_indices = @transform_3, window_bounds = array<i64: 256, 128>}, {pipeline_mode = #tpu.pipeline_mode<synchronous>, transform_indices = @transform_4, window_bounds = array<i64: 1, 128>}, {transform_indices = @transform_5, window_bounds = array<i64: 128, 4>}]} {
    %c0 = arith.constant 0 : index
    %c0_0 = arith.constant 0 : index
    %0 = vector.load %arg1[%c0, %c0_0] : memref<128x512xf32, #tpu.memory_space<vmem>>, vector<128x512xf32>
    %1 = arith.truncf %0 : vector<128x512xf32> to vector<128x512xbf16>
    %c0_1 = arith.constant 0 : index
    %c0_2 = arith.constant 0 : index
    %2 = vector.load %arg2[%c0_1, %c0_2] : memref<512x256xbf16, #tpu.memory_space<vmem>>, vector<512x256xbf16>
    %cst = arith.constant dense<0.000000e+00> : vector<128x256xf32>
    %3 = tpu.matmul %1, %2, %cst {dimension_numbers = #tpu.dot_dimension_numbers<[1], [0], [0], [1], [0, 0, 1, 1], [], []>} : vector<128x512xbf16>, vector<512x256xbf16>, vector<128x256xf32> -> vector<128x256xf32>
    %c0_3 = arith.constant 0 : index
    %c0_4 = arith.constant 0 : index
    %4 = vector.load %arg3[%c0_3, %c0_4] : memref<1x256xf32, #tpu.memory_space<vmem>>, vector<1x256xf32>
    %5 = vector.broadcast %4 : vector<1x256xf32> to vector<128x256xf32>
    %6 = arith.addf %3, %5 : vector<128x256xf32>
    %cst_5 = arith.constant 0.000000e+00 : f32
    %7 = vector.broadcast %cst_5 : f32 to vector<128x256xf32>
    %8 = arith.maximumf %6, %7 : vector<128x256xf32>
    %9 = arith.truncf %8 : vector<128x256xf32> to vector<128x256xbf16>
    %c0_6 = arith.constant 0 : index
    %c0_7 = arith.constant 0 : index
    %10 = vector.load %arg4[%c0_6, %c0_7] : memref<256x128xbf16, #tpu.memory_space<vmem>>, vector<256x128xbf16>
    %cst_8 = arith.constant dense<0.000000e+00> : vector<128x128xf32>
    %11 = tpu.matmul %9, %10, %cst_8 {dimension_numbers = #tpu.dot_dimension_numbers<[1], [0], [0], [1], [0, 0, 1, 1], [], []>} : vector<128x256xbf16>, vector<256x128xbf16>, vector<128x128xf32> -> vector<128x128xf32>
    %c0_9 = arith.constant 0 : index
    %c0_10 = arith.constant 0 : index
    %12 = vector.load %arg5[%c0_9, %c0_10] : memref<1x128xf32, #tpu.memory_space<vmem>>, vector<1x128xf32>
    %13 = vector.broadcast %12 : vector<1x128xf32> to vector<128x128xf32>
    %14 = arith.addf %11, %13 : vector<128x128xf32>
    %cst_11 = arith.constant dense<0xFF800000> : vector<128xf32>
    %15 = vector.multi_reduction <maximumf>, %14, %cst_11 [1] : vector<128x128xf32> to vector<128xf32>
    %16 = vector.shape_cast %15 : vector<128xf32> to vector<128x1xf32>
    %17 = vector.broadcast %16 : vector<128x1xf32> to vector<128x128xf32>
    %18 = arith.subf %14, %17 : vector<128x128xf32>
    %19 = math.exp %18 : vector<128x128xf32>
    %cst_12 = arith.constant dense<0.000000e+00> : vector<128xf32>
    %20 = vector.multi_reduction <add>, %19, %cst_12 [1] : vector<128x128xf32> to vector<128xf32>
    %21 = vector.shape_cast %20 : vector<128xf32> to vector<128x1xf32>
    %22 = math.log %21 : vector<128x1xf32>
    %23 = vector.broadcast %22 : vector<128x1xf32> to vector<128x128xf32>
    %24 = arith.subf %18, %23 : vector<128x128xf32>
    %25 = vector.extract_strided_slice %24 {offsets = [0, 0], sizes = [128, 4], strides = [1, 1]} : vector<128x128xf32> to vector<128x4xf32>
    %c0_13 = arith.constant 0 : index
    %c0_14 = arith.constant 0 : index
    %26 = vector.load %arg6[%c0_13, %c0_14] : memref<128x4xf32, #tpu.memory_space<vmem>>, vector<128x4xf32>
    tpu.vector_store %arg6[%c0_13, %c0_14], %25 {strides = array<i32>} : memref<128x4xf32, #tpu.memory_space<vmem>>, vector<128x4xf32>,
    return
  }
  func.func @transform_0(%arg0: i32) -> (i32, i32) {
    %c0_i32 = arith.constant 0 : i32
    %c0_i32_0 = arith.constant 0 : i32
    return %arg0, %c0_i32 : i32, i32
  }
  func.func @transform_1(%arg0: i32) -> (i32, i32) {
    %c0_i32 = arith.constant 0 : i32
    %c0_i32_0 = arith.constant 0 : i32
    %c0_i32_1 = arith.constant 0 : i32
    return %c0_i32, %c0_i32_0 : i32, i32
  }
  func.func @transform_2(%arg0: i32) -> (i32, i32) {
    %c0_i32 = arith.constant 0 : i32
    %c0_i32_0 = arith.constant 0 : i32
    %c0_i32_1 = arith.constant 0 : i32
    return %c0_i32, %c0_i32_0 : i32, i32
  }
  func.func @transform_3(%arg0: i32) -> (i32, i32) {
    %c0_i32 = arith.constant 0 : i32
    %c0_i32_0 = arith.constant 0 : i32
    %c0_i32_1 = arith.constant 0 : i32
    return %c0_i32, %c0_i32_0 : i32, i32
  }
  func.func @transform_4(%arg0: i32) -> (i32, i32) {
    %c0_i32 = arith.constant 0 : i32
    %c0_i32_0 = arith.constant 0 : i32
    %c0_i32_1 = arith.constant 0 : i32
    return %c0_i32, %c0_i32_0 : i32, i32
  }
  func.func @transform_5(%arg0: i32) -> (i32, i32) {
    %c0_i32 = arith.constant 0 : i32
    %c0_i32_0 = arith.constant 0 : i32
    return %arg0, %c0_i32 : i32, i32
  }
}

</mosaic_0001>

<bundles_post_ra>
// kernel: tpu_custom_call.1
= control target key start
LH: loop header
LB: loop body
LE: loop exit
PB: predicated region body
PF: predicated region fallthrough
CT: control target
= control target key end

     0   :  { %10 = vsyncpa [#allocation3], 0  ;;  %s2549_s0 = inlined_call_operand.hbm [shape: f32[256,512], index: 0, kind: input, shape index: {}]   ;;  %s2550_s1 = inlined_call_operand.hbm [shape: bf16[512,256], index: 1, kind: input, shape index: {}]   ;;  %s2551_s2 = inlined_call_operand.vmem [shape: f32[1,256], index: 2, kind: input, shape index: {}]   ;;  %s2552_s3 = inlined_call_operand.hbm [shape: bf16[256,128], index: 3, kind: input, shape index: {}]   ;;  %s2553_s4 = inlined_call_operand.vmem [shape: f32[1,128], index: 4, kind: input, shape index: {}]   ;;  %s2554_s5 = inlined_call_operand.vmem [shape: f32[256,4], index: 5, kind: output, shape index: {}]  }
   0x1   :  { %12 = vsyncpa [#allocation3 + $0x1], 0 }
   0x2   :  { %13 = vsyncpa [#allocation5], 0  ;;  %s2121_s18 = smov 0   ;;  %s2123_s19 = smov 0  }
   0x3   :  { %s2125_s20 = smov 0   ;;  %s2127_s21 = smov 0  }
   0x4 LB: > { %s1539_s22 = sadd.s32 4294967295, %s2080_s21   ;;  %p39_p0 = scmp.ne.s32.totalorder %s2072_s19, %s2068_s18  ;;  %s2080_s21 = sphi %s2127_s21, %s2570_s21   ;;  %s2076_s20 = sphi %s2125_s20, %s2569_s20   ;;  %s2072_s19 = sphi %s2123_s19, %s2568_s19   ;;  %s2068_s18 = sphi %s2121_s18, %s2567_s18  }
   0x5   : > { %p2143_p1 = scmp.eq.s32.totalorder %s1539_s22, 0  ;;  %p1541_p2 = scmp.ge.s32.totalorder %s2080_s21, 1 }
   0x6   : > { %p160_p3 = scmp.lt.s32.totalorder %s2080_s21, 3  ;;  %s2082_s26 = smov [#allocation4]  }
   0x7   : > { %s2559_s23 = scalar_select %p2143_p1, 1, 0 }
   0x8   : > { %p2151_p4 = por %p2143_p1, %p39_p0  ;;  %p2155_p5 = pnand %p1541_p2, %p160_p3 }
   0x9   : > { %s172_s27 = sshll.u32 %s2082_s26, 4  ;;  %s2083_s29 = smov [#allocation6]   ;;  %s173_s27 = int_to_ptr.vmem [resolvable:$true] %s172_s27 }
   0xa   : > { %s2560_s24 = scalar_select %p2151_p4, 1, 0 }
   0xb   : > { %s2561_s25 = scalar_select %p2155_p5, 1, 0 }
   0xc   : > { %p1730_p6 = pneg %p2155_p5  ;;  %s188_s30 = sshll.u32 %s2083_s29, 4  ;;  %s189_s30 = int_to_ptr.vmem [resolvable:$true] %s188_s30 }
   0xd   : > { %s1973_s6 = scalar_lea.vmem %s173_s27, 8192  ;;  %p1981_p12 = scmp.lt.s32.totalorder %s173_s27, %s173_s27 }
   0xe   : > { %p2163_p7 = pnand %p1730_p6, %p2143_p1  ;;  %p1974_p9 = scmp.ne.s32.totalorder %s173_s27, %s1973_s6 }
   0xf   : > { %p1982_p13 = scmp.lt.s32.totalorder %s1973_s6, %s1973_s6 }
  0x10   : > { %p1964_p8 = pneg %p2163_p7 }
  0x11   : > { %p1983_p0 = por %p1982_p13, %p1981_p12 }
  0x12   : > { %p1976_p10 = pnand %p1974_p9, %p1964_p8 }
  0x14   : > { %p1977_p11 = pneg %p1976_p10 }
  0x16   : > { %p1984_p2 = pnand %p1983_p0, %p1977_p11 }
  0x18   : > { %1987 = shalt.err (!%p1984_p2)
}
  0x19   : > { %s2084_s7 = smov 128   ;;  %s2085_s8 = smov 8  }
  0x1a   : > { %1733 = dma.hbm_to_vmem [thread:$0]  (!%p2163_p7), %s2550_s1, 8192, %s173_s27, [#allocation5], %s2084_s7, %s2084_s7, %s2085_s8  }
  0x1b   : > { %s1999_s11 = scalar_lea.vmem %s189_s30, 2048  ;;  %p2007_p10 = scmp.lt.s32.totalorder %s189_s30, %s189_s30 }
  0x1c   : > { %p2000_p3 = scmp.ne.s32.totalorder %s189_s30, %s1999_s11  ;;  %p2008_p1 = scmp.lt.s32.totalorder %s1999_s11, %s1999_s11 }
  0x1e   : > { %p2002_p6 = pnand %p2000_p3, %p1964_p8  ;;  %p2009_p12 = por %p2008_p1, %p2007_p10 }
  0x20   : > { %p2003_p9 = pneg %p2002_p6 }
  0x22   : > { %p2010_p11 = pnand %p2009_p12, %p2003_p9 }
  0x24   : > { %2013 = shalt.err (!%p2010_p11)
}
  0x25   : > { %s2086_s12 = smov 64   ;;  %s2087_s13 = smov 4  }
  0x26   : > { %1736 = dma.hbm_to_vmem [thread:$0]  (!%p2163_p7), %s2552_s3, 2048, %s189_s30, [#allocation5], %s2086_s12, %s2086_s12, %s2087_s13  }
  0x27   : > { %s2186_s16 = sadd.s32 1, %s2080_s21   ;;  %s26_s18 = sadd.s32 1, %s2076_s20 }
  0x28   : > { %s23_s17 = ssub.s32 %s2080_s21, %s2186_s16  ;;  %p33_p8 = scmp.ne.s32.totalorder %s2076_s20, %s2072_s19 }
  0x29   : > { %p24_p1 = scmp.eq.s32.totalorder %s23_s17, 0  ;;  %p34_p13 = scmp.eq.s32.totalorder %s2080_s21, 0 }
  0x2a   : > { %p1743_p2 = scmp.lt.s32.totalorder %s2080_s21, 2  ;;  %s205_s27 = sand.u32 1, %s2076_s20  }
  0x2b   : > { %s2195_s26 = scalar_select %p24_p1, %s2076_s20, %s26_s18  }
  0x2c   : > { %p35_p0 = por %p34_p13, %p33_p8  ;;  %s1639_s29 = sshll.u32 %s2080_s21, 13 }
  0x2d   : > { %s1545_s6 = sshll.u32 %s205_s27, 9  ;;  %s2203_s8 = scalar_lea.hbm %s2549_s0, %s1639_s29 }
  0x2e   : > { %s209_s30 = scalar_lea.vmem [#allocation2], %s1545_s6  ;;  %p2205_p7 = pnand %p1743_p2, %p35_p0 }
  0x2f   : > { %s217_s9 = sshll.u32 %s209_s30, 4  ;;  %s2211_s11 = scalar_lea.sflag [#allocation3], %s205_s27  ;;  %s2209_s9 = int_to_ptr.vmem [resolvable:$true] %s217_s9 }
  0x30   : > { %s2014_s12 = scalar_lea.hbm %s2203_s8, 8192  ;;  %p2016_p6 = pneg %p2205_p7 }
  0x31   : > { %p2015_p3 = scmp.ne.s32.totalorder %s2203_s8, %s2014_s12  ;;  %s2019_s15 = scalar_lea.hbm %s2549_s0, 16384 }
  0x32   : > { %p2020_p12 = scmp.lt.s32.totalorder %s2203_s8, %s2549_s0  ;;  %p2021_p11 = scmp.lt.s32.totalorder %s2019_s15, %s2014_s12 }
  0x33   : > { %p2017_p9 = pnand %p2016_p6, %p2015_p3 }
  0x34   : > { %p2022_p1 = por %p2021_p11, %p2020_p12 }
  0x35   : > { %p2018_p10 = pneg %p2017_p9 }
  0x37   : > { %p2023_p8 = pnand %p2022_p1, %p2018_p10 }
  0x39   : > { %2026 = shalt.err (!%p2023_p8)
}
  0x3a   : > { %s2027_s27 = scalar_lea.vmem %s2209_s9, 8192  ;;  %s2088_s29 = smov [#allocation2]  }
  0x3b   : > { %p2028_p13 = scmp.ne.s32.totalorder %s2209_s9, %s2027_s27  ;;  %s2032_s6 = sshll.u32 %s2088_s29, 4  ;;  %s2033_s6 = int_to_ptr.vmem [resolvable:$false] %s2032_s6 }
  0x3c   : > { %s2034_s28 = scalar_lea.vmem %s2033_s6, 16384  ;;  %p2035_p3 = scmp.lt.s32.totalorder %s2209_s9, %s2033_s6 }
  0x3d   : > { %p2030_p0 = pnand %p2028_p13, %p2016_p6  ;;  %p2036_p9 = scmp.lt.s32.totalorder %s2034_s28, %s2027_s27 }
  0x3f   : > { %p2031_p2 = pneg %p2030_p0  ;;  %p2037_p4 = por %p2036_p9, %p2035_p3 }
  0x41   : > { %p2038_p5 = pnand %p2037_p4, %p2031_p2 }
  0x43   : > { %2041 = shalt.err (!%p2038_p5)
}
  0x44   : > { %s2089_s7 = smov 512   ;;  %s2090_s30 = smov 32  }
  0x45   : > { %1740 = dma.hbm_to_vmem [thread:$0]  (!%p2205_p7), %s2203_s8, 8192, %s2209_s9, %s2211_s11, %s2089_s7, %s2089_s7, %s2090_s30  }
  0x46   : > { %p2564_p6 = scmp.ne.s32.totalorder %s2561_s25, 0 }
  0x47   : > { %s231_s12 = sand.u32 (!%p2564_p6), 1, %s2072_s19   ;;  %p2565_p4 = scmp.ne.s32.totalorder (!%p2564_p6), %s2560_s24, 0 }
  0x48   : > { %229 = sbr.rel (%p2564_p6) target bundleno = 926 (0x39e), region = 40  ;;  %s1550_s13 = sshll.u32 (!%p2564_p6), %s231_s12, 9 }
  0x49   : > { %s232_s14 = scalar_lea.sflag (!%p2564_p6), [#allocation3], %s231_s12  ;;  %s2235_s15 = scalar_lea.vmem (!%p2564_p6), [#allocation2], %s1550_s13 }
  0x4d   : > { %2059 = dma.done.wait (%p2565_p4), %s232_s14, 8192  }
  0x4e   : > { %2061 = vsyncadd (%p2565_p4), %s232_s14, 4294959104  ;;  %p2566_p5 = scmp.ne.s32.totalorder %s2559_s23, 0 }
  0x50   : > { %2063 = dma.done.wait (%p2566_p5), [#allocation5], 10240  }
  0x51   : > { %2065 = vsyncadd (%p2566_p5), [#allocation5], 4294957056  ;;  %v1786_v0 = vld [vmem:[#allocation4 + $0x74] ss:$8 sps:$4 sm:$0xff]   ;;  %v1790_v2 = vld [vmem:[#allocation4 + $0x70] ss:$8 sps:$4 sm:$0xff]  }
  0x52   : > { %v1788_v1 = vld [vmem:[#allocation4 + $0x174] ss:$8 sps:$4 sm:$0xff]   ;;  %770 = vmatprep.subr.bf16.mxu0 %v1786_v0  ;;  %v1791_v3 = vld [vmem:[#allocation4 + $0x170] ss:$8 sps:$4 sm:$0xff]   ;;  %v1792_v4 = vld [vmem:[#allocation4 + $0x64] ss:$8 sps:$4 sm:$0xff]  }
  0x53   : > { %883 = vmatprep.subr.bf16.mxu1 %v1788_v1  ;;  %771 = vmatpush1.bf16.msra.mxu0 %v1790_v2  ;;  %v1794_v5 = vld [vmem:[#allocation4 + $0x164] ss:$8 sps:$4 sm:$0xff]   ;;  %v1796_v6 = vld [vmem:[#allocation4 + $0x60] ss:$8 sps:$4 sm:$0xff]   ;;  %v1798_v8 = vld [vmem:[#allocation4 + $0x54] ss:$8 sps:$4 sm:$0xff]  }
  0x54   : > { %884 = vmatpush1.bf16.msra.mxu1 %v1791_v3  ;;  %772 = vmatprep.subr.bf16.mxu0 %v1792_v4  ;;  %v1797_v7 = vld [vmem:[#allocation4 + $0x160] ss:$8 sps:$4 sm:$0xff]   ;;  %v1800_v9 = vld [vmem:[#allocation4 + $0x154] ss:$8 sps:$4 sm:$0xff]   ;;  %v1802_v10 = vld [vmem:[#allocation4 + $0x50] ss:$8 sps:$4 sm:$0xff]  }
  0x55   : > { %885 = vmatprep.subr.bf16.mxu1 %v1794_v5  ;;  %v1803_v11 = vld [vmem:[#allocation4 + $0x150] ss:$8 sps:$4 sm:$0xff]   ;;  %v1804_v12 = vld [vmem:[#allocation4 + $0x44] ss:$8 sps:$4 sm:$0xff]   ;;  %v1808_v14 = vld [vmem:[#allocation4 + $0x40] ss:$8 sps:$4 sm:$0xff]  }
  0x56   : > { %v1806_v13 = vld [vmem:[#allocation4 + $0x144] ss:$8 sps:$4 sm:$0xff]   ;;  %v1809_v15 = vld [vmem:[#allocation4 + $0x140] ss:$8 sps:$4 sm:$0xff]   ;;  %v1810_v16 = vld [vmem:[#allocation4 + $0x34] ss:$8 sps:$4 sm:$0xff]  }
  0x57   : > { %773 = vmatpush1.bf16.msra.mxu0 %v1796_v6  ;;  %v1812_v17 = vld [vmem:[#allocation4 + $0x134] ss:$8 sps:$4 sm:$0xff]   ;;  %v1814_v18 = vld [vmem:[#allocation4 + $0x30] ss:$8 sps:$4 sm:$0xff]   ;;  %v1816_v20 = vld [vmem:[#allocation4 + $0x24] ss:$8 sps:$4 sm:$0xff]  }
  0x58   : > { %886 = vmatpush1.bf16.msra.mxu1 %v1797_v7  ;;  %774 = vmatprep.subr.bf16.mxu0 %v1798_v8  ;;  %v1815_v19 = vld [vmem:[#allocation4 + $0x130] ss:$8 sps:$4 sm:$0xff]   ;;  %v1818_v21 = vld [vmem:[#allocation4 + $0x124] ss:$8 sps:$4 sm:$0xff]   ;;  %v1820_v22 = vld [vmem:[#allocation4 + $0x20] ss:$8 sps:$4 sm:$0xff]  }
  0x59   : > { %887 = vmatprep.subr.bf16.mxu1 %v1800_v9  ;;  %v1821_v23 = vld [vmem:[#allocation4 + $0x120] ss:$8 sps:$4 sm:$0xff]   ;;  %v1822_v24 = vld [vmem:[#allocation4 + $0x14] ss:$8 sps:$4 sm:$0xff]   ;;  %v1826_v26 = vld [vmem:[#allocation4 + $0x10] ss:$8 sps:$4 sm:$0xff]  }
  0x5a   : > { %v1824_v25 = vld [vmem:[#allocation4 + $0x114] ss:$8 sps:$4 sm:$0xff]   ;;  %v1827_v27 = vld [vmem:[#allocation4 + $0x110] ss:$8 sps:$4 sm:$0xff]   ;;  %v1828_v28 = vld [vmem:[#allocation4 + $0x4] ss:$8 sps:$4 sm:$0xff]  }
  0x5b   : > { %775 = vmatpush1.bf16.msra.mxu0 %v1802_v10  ;;  %v1830_v29 = vld [vmem:[#allocation4 + $0x104] ss:$8 sps:$4 sm:$0xff]   ;;  %v1832_v30 = vld [vmem:[#allocation4] ss:$8 sps:$4 sm:$0xff]   ;;  %v1834_v32 = vld [vmem:[#allocation4 + $0xf4] ss:$8 sps:$4 sm:$0xff]  }
  0x5c   : > { %888 = vmatpush1.bf16.msra.mxu1 %v1803_v11  ;;  %776 = vmatprep.subr.bf16.mxu0 %v1804_v12  ;;  %v1833_v31 = vld [vmem:[#allocation4 + $0x100] ss:$8 sps:$4 sm:$0xff]   ;;  %v1836_v33 = vld [vmem:[#allocation4 + $0x1f4] ss:$8 sps:$4 sm:$0xff]   ;;  %v1838_v34 = vld [vmem:[#allocation4 + $0xf0] ss:$8 sps:$4 sm:$0xff]  }
  0x5d   : > { %889 = vmatprep.subr.bf16.mxu1 %v1806_v13  ;;  %v1839_v35 = vld [vmem:[#allocation4 + $0x1f0] ss:$8 sps:$4 sm:$0xff]   ;;  %v1840_v36 = vld [vmem:[#allocation4 + $0xe4] ss:$8 sps:$4 sm:$0xff]   ;;  %v1844_v38 = vld [vmem:[#allocation4 + $0xe0] ss:$8 sps:$4 sm:$0xff]  }
  0x5e   : > { %v1842_v37 = vld [vmem:[#allocation4 + $0x1e4] ss:$8 sps:$4 sm:$0xff]   ;;  %v1845_v39 = vld [vmem:[#allocation4 + $0x1e0] ss:$8 sps:$4 sm:$0xff]   ;;  %v1846_v40 = vld [vmem:[#allocation4 + $0xd4] ss:$8 sps:$4 sm:$0xff]  }
  0x5f   : > { %777 = vmatpush1.bf16.msra.mxu0 %v1808_v14  ;;  %v1848_v41 = vld [vmem:[#allocation4 + $0x1d4] ss:$8 sps:$4 sm:$0xff]   ;;  %v1850_v42 = vld [vmem:[#allocation4 + $0xd0] ss:$8 sps:$4 sm:$0xff]   ;;  %v1852_v44 = vld [vmem:[#allocation4 + $0xc4] ss:$8 sps:$4 sm:$0xff]  }
  0x60   : > { %890 = vmatpush1.bf16.msra.mxu1 %v1809_v15  ;;  %778 = vmatprep.subr.bf16.mxu0 %v1810_v16  ;;  %v1851_v43 = vld [vmem:[#allocation4 + $0x1d0] ss:$8 sps:$4 sm:$0xff]   ;;  %v1854_v45 = vld [vmem:[#allocation4 + $0x1c4] ss:$8 sps:$4 sm:$0xff]   ;;  %v1856_v50 = vld [vmem:[#allocation4 + $0xc0] ss:$8 sps:$4 sm:$0xff]  }
  0x61   : > { %891 = vmatprep.subr.bf16.mxu1 %v1812_v17  ;;  %v279_v46 = vld [vmem:[%s2235_s15 + $0x8] sm:$0xff]  ;;  %v281_v48 = vld [vmem:[%s2235_s15 + $0x18] sm:$0xff]  ;;  %v278_v6 = vld [vmem:[%s2235_s15] sm:$0xff]  ;;  %s1553_s9 = sshll.u32 %s1539_s22, 4  ;;  %vm1436_vm0 = vcmask 31744  }
  0x62   : > { %v283_v47 = vld [vmem:[%s2235_s15 + $0x28] sm:$0xff]  ;;  %v285_v49 = vld [vmem:[%s2235_s15 + $0x38] sm:$0xff]  ;;  %v282_v7 = vld [vmem:[%s2235_s15 + $0x20] sm:$0xff]  ;;  %p272_p7 = scmp.lt.s32.totalorder %s1553_s9, 31 }
  0x63   : > { %779 = vmatpush1.bf16.msra.mxu0 %v1814_v18  ;;  %v1857_v51 = vld [vmem:[#allocation4 + $0x1c0] ss:$8 sps:$4 sm:$0xff]   ;;  %v343_v52 = vpack.c.bf16 %v283_v47, %v279_v46  ;;  %v345_v53 = vpack.c.bf16 %v285_v49, %v281_v48  ;;  %v1858_v54 = vld [vmem:[#allocation4 + $0xb4] ss:$8 sps:$4 sm:$0xff]   ;;  %v1862_v56 = vld [vmem:[#allocation4 + $0xb0] ss:$8 sps:$4 sm:$0xff]   ;;  %v342_v14 = vpack.c.bf16 %v282_v7, %v278_v6 }
  0x64   : > { %892 = vmatpush1.bf16.msra.mxu1 %v1815_v19  ;;  %780 = vmatprep.subr.bf16.mxu0 %v1816_v20  ;;  %v1860_v55 = vld [vmem:[#allocation4 + $0x1b4] ss:$8 sps:$4 sm:$0xff]   ;;  %v1863_v57 = vld [vmem:[#allocation4 + $0x1b0] ss:$8 sps:$4 sm:$0xff]   ;;  %v1864_v58 = vld [vmem:[#allocation4 + $0xa4] ss:$8 sps:$4 sm:$0xff]  }
  0x65   : > { %893 = vmatprep.subr.bf16.mxu1 %v1818_v21  ;;  %802 = vmatprep.mubr.bf16.mxu0 %v343_v52  ;;  %v1866_v59 = vld [vmem:[#allocation4 + $0x1a4] ss:$8 sps:$4 sm:$0xff]   ;;  %v1868_v60 = vld [vmem:[#allocation4 + $0xa0] ss:$8 sps:$4 sm:$0xff]   ;;  %v1870_v62 = vld [vmem:[#allocation4 + $0x94] ss:$8 sps:$4 sm:$0xff]  }
  0x66   : > { %915 = vmatprep.mubr.bf16.mxu1 %v345_v53  ;;  %v1869_v61 = vld [vmem:[#allocation4 + $0x1a0] ss:$8 sps:$4 sm:$0xff]   ;;  %v1872_v63 = vld [vmem:[#allocation4 + $0x194] ss:$8 sps:$4 sm:$0xff]   ;;  %v1874_v0 = vld [vmem:[#allocation4 + $0x90] ss:$8 sps:$4 sm:$0xff]  }
  0x67   : > { %781 = vmatpush1.bf16.msra.mxu0 %v1820_v22  ;;  %v1875_v1 = vld [vmem:[#allocation4 + $0x190] ss:$8 sps:$4 sm:$0xff]   ;;  %v1876_v2 = vld [vmem:[#allocation4 + $0x84] ss:$8 sps:$4 sm:$0xff]   ;;  %v1880_v4 = vld [vmem:[#allocation4 + $0x80] ss:$8 sps:$4 sm:$0xff]  }
  0x68   : > { %894 = vmatpush1.bf16.msra.mxu1 %v1821_v23  ;;  %782 = vmatprep.subr.bf16.mxu0 %v1822_v24  ;;  %v1878_v3 = vld [vmem:[#allocation4 + $0x184] ss:$8 sps:$4 sm:$0xff]   ;;  %v1881_v5 = vld [vmem:[#allocation4 + $0x180] ss:$8 sps:$4 sm:$0xff]   ;;  %v280_v8 = vld [vmem:[%s2235_s15 + $0x10] sm:$0xff]  ;;  %s2572_s9 = smov (!%p272_p7, %s1553_s9), 31 }
  0x69   : > { %895 = vmatprep.subr.bf16.mxu1 %v1824_v25  ;;  %v284_v9 = vld [vmem:[%s2235_s15 + $0x30] sm:$0xff]  ;;  %v287_v10 = vld [vmem:[%s2235_s15 + $0x48] sm:$0xff]  ;;  %v289_v12 = vld [vmem:[%s2235_s15 + $0x58] sm:$0xff]  ;;  %s1554_s10 = sshll.u32 %s2572_s9, 3 }
  0x6a   : > { %v291_v11 = vld [vmem:[%s2235_s15 + $0x68] sm:$0xff]  ;;  %v293_v13 = vld [vmem:[%s2235_s15 + $0x78] sm:$0xff]  ;;  %v344_v15 = vpack.c.bf16 %v284_v9, %v280_v8  ;;  %v286_v20 = vld [vmem:[%s2235_s15 + $0x40] sm:$0xff]  ;;  %s2486_s18 = scalar_lea.vmem %s2554_s5, %s1554_s10 }
  0x6b   : > { %783 = vmatpush1.bf16.msra.mxu0 %v1826_v26  ;;  %v347_v16 = vpack.c.bf16 %v291_v11, %v287_v10  ;;  %v349_v17 = vpack.c.bf16 %v293_v13, %v289_v12  ;;  %v1882_v18 = vld [vmem:[#allocation6 + $0x78] sm:$0xff]   ;;  %v290_v21 = vld [vmem:[%s2235_s15 + $0x60] sm:$0xff]  ;;  %v288_v22 = vld [vmem:[%s2235_s15 + $0x50] sm:$0xff] }
  0x6c   : > { %896 = vmatpush1.bf16.msra.mxu1 %v1827_v27  ;;  %784 = vmatprep.subr.bf16.mxu0 %v1828_v28  ;;  %v1883_v19 = vld [vmem:[#allocation6 + $0x38] sm:$0xff]   ;;  %v292_v23 = vld [vmem:[%s2235_s15 + $0x70] sm:$0xff]  ;;  %v295_v25 = vld [vmem:[%s2235_s15 + $0x88] sm:$0xff] }
  0x6d   : > { %897 = vmatprep.subr.bf16.mxu1 %v1830_v29  ;;  %v1884_v24 = vld [vmem:[#allocation6 + $0x70] sm:$0xff]   ;;  %v299_v26 = vld [vmem:[%s2235_s15 + $0xa8] sm:$0xff]  ;;  %v297_v27 = vld [vmem:[%s2235_s15 + $0x98] sm:$0xff] }
  0x6e   : > { %v301_v28 = vld [vmem:[%s2235_s15 + $0xb8] sm:$0xff]  ;;  %v1885_v29 = vld [vmem:[#allocation6 + $0x30] sm:$0xff]   ;;  %v306_v52 = vld [vmem:[%s2235_s15 + $0xe0] sm:$0xff] }
  0x6f   : > { %785 = vmatpush1.bf16.msra.mxu0 %v1832_v30  ;;  %v1886_v30 = vld [vmem:[#allocation6 + $0x68] sm:$0xff]   ;;  %v1890_v46 = vld [vmem:[#allocation6 + $0x58] sm:$0xff]   ;;  %v304_v53 = vld [vmem:[%s2235_s15 + $0xd0] sm:$0xff] }
  0x70   : > { %898 = vmatpush1.bf16.msra.mxu1 %v1833_v31  ;;  %786 = vmatprep.subr.bf16.mxu0 %v1834_v32  ;;  %v346_v31 = vpack.c.bf16 %v290_v21, %v286_v20  ;;  %v348_v32 = vpack.c.bf16 %v292_v23, %v288_v22  ;;  %v325_v6 = vld [vmem:[%s2235_s15 + $0x178] sm:$0xff]  ;;  %v318_v11 = vld [vmem:[%s2235_s15 + $0x140] sm:$0xff]  ;;  %v320_v13 = vld [vmem:[%s2235_s15 + $0x150] sm:$0xff] }
  0x71   : > { %899 = vmatprep.subr.bf16.mxu1 %v1836_v33  ;;  %v351_v33 = vpack.c.bf16 %v299_v26, %v295_v25  ;;  %v322_v12 = vld [vmem:[%s2235_s15 + $0x160] sm:$0xff]  ;;  %v328_v25 = vld [vmem:[%s2235_s15 + $0x190] sm:$0xff] }
  0x72   : > { %v326_v23 = vld [vmem:[%s2235_s15 + $0x180] sm:$0xff]  ;;  %v332_v26 = vld [vmem:[%s2235_s15 + $0x1b0] sm:$0xff] }
  0x73   : > { %787 = vmatpush2.bf16.msra.mxu0 %v1838_v34  ;;  %v353_v34 = vpack.c.bf16 %v301_v28, %v297_v27  ;;  %v335_v27 = vld [vmem:[%s2235_s15 + $0x1c8] sm:$0xff] }
  0x74   : > { %900 = vmatpush2.bf16.msra.mxu1 %v1839_v35  ;;  %788 = vmatprep.subr.bf16.mxu0 %v1840_v36  ;;  %v1887_v35 = vld [vmem:[#allocation6 + $0x28] sm:$0xff]   ;;  %v1888_v36 = vld [vmem:[#allocation6 + $0x60] sm:$0xff]  }
  0x75   : > { %901 = vmatprep.subr.bf16.mxu1 %v1842_v37  ;;  %v294_v37 = vld [vmem:[%s2235_s15 + $0x80] sm:$0xff]  ;;  %v339_v28 = vld [vmem:[%s2235_s15 + $0x1e8] sm:$0xff] }
  0x77   : > { %789 = vmatpush2.bf16.msra.mxu0 %v1844_v38  ;;  %v298_v38 = vld [vmem:[%s2235_s15 + $0xa0] sm:$0xff] }
  0x78   : > { %902 = vmatpush2.bf16.msra.mxu1 %v1845_v39  ;;  %790 = vmatprep.subr.bf16.mxu0 %v1846_v40  ;;  %v296_v39 = vld [vmem:[%s2235_s15 + $0x90] sm:$0xff]  ;;  %v350_v47 = vpack.c.bf16 %v298_v38, %v294_v37 }
  0x79   : > { %903 = vmatprep.subr.bf16.mxu1 %v1848_v41  ;;  %v300_v40 = vld [vmem:[%s2235_s15 + $0xb0] sm:$0xff]  ;;  %v303_v41 = vld [vmem:[%s2235_s15 + $0xc8] sm:$0xff] }
  0x7a   : > { %v352_v48 = vpack.c.bf16 %v300_v40, %v296_v39  ;;  %v336_v37 = vld [vmem:[%s2235_s15 + $0x1d0] sm:$0xff] }
  0x7b   : > { %791 = vmatpush2.bf16.msra.mxu0 %v1850_v42  ;;  %v307_v42 = vld [vmem:[%s2235_s15 + $0xe8] sm:$0xff]  ;;  %v340_v38 = vld [vmem:[%s2235_s15 + $0x1f0] sm:$0xff] }
  0x7c   : > { %904 = vmatpush2.bf16.msra.mxu1 %v1851_v43  ;;  %792 = vmatprep.subr.bf16.mxu0 %v1852_v44  ;;  %v305_v43 = vld [vmem:[%s2235_s15 + $0xd8] sm:$0xff]  ;;  %v355_v49 = vpack.c.bf16 %v307_v42, %v303_v41  ;;  %v372_v40 = vpack.c.bf16 %v340_v38, %v336_v37  ;;  %v1892_v42 = vld [vmem:[#allocation6 + $0x50] sm:$0xff]  }
  0x7d   : > { %905 = vmatprep.subr.bf16.mxu1 %v1854_v45  ;;  %v309_v44 = vld [vmem:[%s2235_s15 + $0xf8] sm:$0xff]  ;;  %v1889_v45 = vld [vmem:[#allocation6 + $0x20] sm:$0xff]  }
  0x7e   : > { %v1891_v41 = vld [vmem:[#allocation6 + $0x18] sm:$0xff]  }
  0x7f   : > { %793 = vmatpush2.bf16.msra.mxu0 %v1856_v50  ;;  %v357_v50 = vpack.c.bf16 %v309_v44, %v305_v43  ;;  %v1893_v43 = vld [vmem:[#allocation6 + $0x10] sm:$0xff]   ;;  %v1894_v44 = vld [vmem:[#allocation6 + $0x48] sm:$0xff]  }
  0x80   : > { %906 = vmatpush2.bf16.msra.mxu1 %v1857_v51  ;;  %794 = vmatprep.subr.bf16.mxu0 %v1858_v54  ;;  %v302_v51 = vld [vmem:[%s2235_s15 + $0xc0] sm:$0xff]  ;;  %v308_v54 = vld [vmem:[%s2235_s15 + $0xf0] sm:$0xff] }
  0x81   : > { %907 = vmatprep.subr.bf16.mxu1 %v1860_v55  ;;  %v311_v55 = vld [vmem:[%s2235_s15 + $0x108] sm:$0xff] }
  0x83   : > { %795 = vmatpush2.bf16.msra.mxu0 %v1862_v56  ;;  %v315_v56 = vld [vmem:[%s2235_s15 + $0x128] sm:$0xff] }
  0x84   : > { %908 = vmatpush2.bf16.msra.mxu1 %v1863_v57  ;;  %796 = vmatprep.subr.bf16.mxu0 %v1864_v58  ;;  %v313_v57 = vld [vmem:[%s2235_s15 + $0x118] sm:$0xff] }
  0x85   : > { %909 = vmatprep.subr.bf16.mxu1 %v1866_v59  ;;  %v317_v58 = vld [vmem:[%s2235_s15 + $0x138] sm:$0xff]  ;;  %v354_v59 = vpack.c.bf16 %v306_v52, %v302_v51  ;;  %v438_v52 = vld [vmem:[%s2551_s2] sm:$0x3] }
  0x87   : > { %797 = vmatpush2.bf16.msra.mxu0 %v1868_v60  ;;  %v356_v60 = vpack.c.bf16 %v308_v54, %v304_v53 }
  0x88   : > { %910 = vmatpush2.bf16.msra.mxu1 %v1869_v61  ;;  %798 = vmatprep.subr.bf16.mxu0 %v1870_v62  ;;  %v359_v61 = vpack.c.bf16 %v315_v56, %v311_v55  ;;  %v361_v62 = vpack.c.bf16 %v317_v58, %v313_v57 }
  0x89   : > { %911 = vmatprep.subr.bf16.mxu1 %v1872_v63  ;;  %v310_v63 = vld [vmem:[%s2235_s15 + $0x100] sm:$0xff] }
  0x8b   : > { %799 = vmatpush2.bf16.msra.mxu0 %v1874_v0  ;;  %v314_v0 = vld [vmem:[%s2235_s15 + $0x120] sm:$0xff] }
  0x8c   : > { %912 = vmatpush2.bf16.msra.mxu1 %v1875_v1  ;;  %800 = vmatprep.subr.bf16.mxu0 %v1876_v2  ;;  %v312_v1 = vld [vmem:[%s2235_s15 + $0x110] sm:$0xff]  ;;  %v358_v7 = vpack.c.bf16 %v314_v0, %v310_v63 }
  0x8d   : > { %913 = vmatprep.subr.bf16.mxu1 %v1878_v3  ;;  %v316_v2 = vld [vmem:[%s2235_s15 + $0x130] sm:$0xff]  ;;  %v319_v3 = vld [vmem:[%s2235_s15 + $0x148] sm:$0xff] }
  0x8e   : > { %v360_v8 = vpack.c.bf16 %v316_v2, %v312_v1 }
  0x8f   : > { %801 = vmatpush2.bf16.msra.mxu0 %v1880_v4  ;;  %v323_v4 = vld [vmem:[%s2235_s15 + $0x168] sm:$0xff] }
  0x90   : > { %914 = vmatpush2.bf16.msra.mxu1 %v1881_v5  ;;  %1640 = vmatprep.subr.bf16.mxu0 %v1882_v18  ;;  %v321_v5 = vld [vmem:[%s2235_s15 + $0x158] sm:$0xff]  ;;  %v363_v9 = vpack.c.bf16 %v323_v4, %v319_v3 }
  0x91   : > { %1704 = vmatprep.subr.bf16.mxu1 %v1882_v18  ;;  %v365_v10 = vpack.c.bf16 %v325_v6, %v321_v5  ;;  %v333_v18 = vld [vmem:[%s2235_s15 + $0x1b8] sm:$0xff] }
  0x92   : > { %803 = vmatmul.mubr.bf16.vlgmr.msra.gmra.mxu0 %v342_v14  ;;  %v324_v14 = vld [vmem:[%s2235_s15 + $0x170] sm:$0xff] }
  0x93   : > { %916 = vmatmul.mubr.bf16.vlgmr.msra.gmra.mxu1 %v344_v15  ;;  %812 = vmatprep.mubr.bf16.mxu0 %v347_v16  ;;  %v327_v15 = vld [vmem:[%s2235_s15 + $0x188] sm:$0xff]  ;;  %v364_v20 = vpack.c.bf16 %v324_v14, %v320_v13 }
  0x94   : > { %925 = vmatprep.mubr.bf16.mxu1 %v349_v17  ;;  %1641 = vmatpush3.bf16.msra.mxu0 %v1883_v19  ;;  %v331_v16 = vld [vmem:[%s2235_s15 + $0x1a8] sm:$0xff]  ;;  %v329_v17 = vld [vmem:[%s2235_s15 + $0x198] sm:$0xff] }
  0x95   : > { %1712 = vmatpush3.bf16.msra.mxu1 %v1883_v19  ;;  %1642 = vmatprep.subr.bf16.mxu0 %v1884_v24  ;;  %v362_v19 = vpack.c.bf16 %v322_v12, %v318_v11  ;;  %v367_v21 = vpack.c.bf16 %v331_v16, %v327_v15  ;;  %v369_v22 = vpack.c.bf16 %v333_v18, %v329_v17 }
  0x96   : > { %1705 = vmatprep.subr.bf16.mxu1 %v1884_v24  ;;  %v330_v24 = vld [vmem:[%s2235_s15 + $0x1a0] sm:$0xff] }
  0x98   : > { %1643 = vmatpush3.bf16.msra.mxu0 %v1885_v29 }
  0x99   : > { %1713 = vmatpush3.bf16.msra.mxu1 %v1885_v29  ;;  %1644 = vmatprep.subr.bf16.mxu0 %v1886_v30  ;;  %v337_v29 = vld [vmem:[%s2235_s15 + $0x1d8] sm:$0xff] }
  0x9a   : > { %1706 = vmatprep.subr.bf16.mxu1 %v1886_v30  ;;  %813 = vmatmul.mubr.bf16.gmra.mxu0 %v346_v31  ;;  %v341_v30 = vld [vmem:[%s2235_s15 + $0x1f8] sm:$0xff]  ;;  %v366_v31 = vpack.c.bf16 %v330_v24, %v326_v23 }
  0x9b   : > { %926 = vmatmul.mubr.bf16.gmra.mxu1 %v348_v32  ;;  %822 = vmatprep.mubr.bf16.mxu0 %v351_v33  ;;  %v368_v32 = vpack.c.bf16 %v332_v26, %v328_v25  ;;  %v371_v33 = vpack.c.bf16 %v339_v28, %v335_v27 }
  0x9c   : > { %935 = vmatprep.mubr.bf16.mxu1 %v353_v34  ;;  %1645 = vmatpush3.bf16.msra.mxu0 %v1887_v35  ;;  %v373_v34 = vpack.c.bf16 %v341_v30, %v337_v29 }
  0x9d   : > { %1714 = vmatpush3.bf16.msra.mxu1 %v1887_v35  ;;  %1646 = vmatprep.subr.bf16.mxu0 %v1888_v36  ;;  %v334_v35 = vld [vmem:[%s2235_s15 + $0x1c0] sm:$0xff] }
  0x9e   : > { %1707 = vmatprep.subr.bf16.mxu1 %v1888_v36  ;;  %v338_v36 = vld [vmem:[%s2235_s15 + $0x1e0] sm:$0xff] }
  0x9f   : > { %v370_v39 = vpack.c.bf16 %v338_v36, %v334_v35 }
  0xa0   : > { %1647 = vmatpush3.bf16.msra.mxu0 %v1889_v45 }
  0xa1   : > { %1715 = vmatpush3.bf16.msra.mxu1 %v1889_v45  ;;  %1648 = vmatprep.subr.bf16.mxu0 %v1890_v46  ;;  %v1895_v45 = vld [vmem:[#allocation6 + $0x8] sm:$0xff]  }
  0xa2   : > { %1708 = vmatprep.subr.bf16.mxu1 %v1890_v46  ;;  %823 = vmatmul.mubr.bf16.gmra.mxu0 %v350_v47  ;;  %v1896_v46 = vld [vmem:[#allocation6 + $0x40] sm:$0xff]  }
  0xa3   : > { %936 = vmatmul.mubr.bf16.gmra.mxu1 %v352_v48  ;;  %832 = vmatprep.mubr.bf16.mxu0 %v355_v49  ;;  %v1897_v47 = vld [vmem:[#allocation6] sm:$0xff]   ;;  %v440_v48 = vlaneseq }
  0xa4   : > { %945 = vmatprep.mubr.bf16.mxu1 %v357_v50  ;;  %1649 = vmatpush3.bf16.msra.mxu0 %v1891_v41 }
  0xa5   : > { %1716 = vmatpush3.bf16.msra.mxu1 %v1891_v41  ;;  %1650 = vmatprep.subr.bf16.mxu0 %v1892_v42  ;;  %v441_v49 = vshrl.u32 %v440_v48, 7 }
  0xa6   : > { %1709 = vmatprep.subr.bf16.mxu1 %v1892_v42 }
  0xa7   : > { %v446_v50 = vsub.s32 1, %v441_v49  ;;  %v442_v51 = vsub.s32 0, %v441_v49 }
  0xa8   : > { %1651 = vmatpush3.bf16.msra.mxu0 %v1893_v43 }
  0xa9   : > { %1717 = vmatpush3.bf16.msra.mxu1 %v1893_v43  ;;  %1652 = vmatprep.subr.bf16.mxu0 %v1894_v44  ;;  %v2312_v53 = vrot.slane %v438_v52, %v446_v50  ;;  %v2314_v54 = vrot.slane %v438_v52, %v442_v51 }
  0xaa   : > { %833 = vmatmul.mubr.bf16.gmra.mxu0 %v354_v59  ;;  %1710 = vmatprep.subr.bf16.mxu1 %v1894_v44 }
  0xab   : > { %946 = vmatmul.mubr.bf16.gmra.mxu1 %v356_v60  ;;  %842 = vmatprep.mubr.bf16.mxu0 %v359_v61 }
  0xac   : > { %955 = vmatprep.mubr.bf16.mxu1 %v361_v62  ;;  %1653 = vmatpush3.bf16.msra.mxu0 %v1895_v45 }
  0xad   : > { %1718 = vmatpush3.bf16.msra.mxu1 %v1895_v45  ;;  %1654 = vmatprep.subr.bf16.mxu0 %v1896_v46 }
  0xae   : > { %1711 = vmatprep.subr.bf16.mxu1 %v1896_v46 }
  0xb0   : > { %1655 = vmatpush3.bf16.msra.mxu0 %v1897_v47 }
  0xb1   : > { %1719 = vmatpush3.bf16.msra.mxu1 %v1897_v47 }
  0xb2   : > { %843 = vmatmul.mubr.bf16.gmra.mxu0 %v358_v7 }
  0xb3   : > { %956 = vmatmul.mubr.bf16.gmra.mxu1 %v360_v8  ;;  %852 = vmatprep.mubr.bf16.mxu0 %v363_v9 }
  0xb4   : > { %965 = vmatprep.mubr.bf16.mxu1 %v365_v10 }
  0xba   : > { %853 = vmatmul.mubr.bf16.gmra.mxu0 %v362_v19 }
  0xbb   : > { %966 = vmatmul.mubr.bf16.gmra.mxu1 %v364_v20  ;;  %862 = vmatprep.mubr.bf16.mxu0 %v367_v21 }
  0xbc   : > { %975 = vmatprep.mubr.bf16.mxu1 %v369_v22 }
  0xc2   : > { %863 = vmatmul.mubr.bf16.gmra.mxu0 %v366_v31 }
  0xc3   : > { %976 = vmatmul.mubr.bf16.gmra.mxu1 %v368_v32  ;;  %872 = vmatprep.mubr.bf16.mxu0 %v371_v33 }
  0xc4   : > { %985 = vmatprep.mubr.bf16.mxu1 %v373_v34 }
  0xca   : > { %873 = vmatmul.mubr.bf16.gmra.mxu0 %v370_v39 }
  0xcb   : > { %986 = vmatmul.mubr.bf16.gmra.mxu1 %v372_v40 }
 0x152   : > { %v804_v55 = vpop.f32.mrf.mxu0 }
 0x153   : > { %v917_v56 = vpop.f32.mrf.mxu1  ;;  %v805_v60 = vadd.f32 %v804_v55, %v2314_v54 }
 0x154   : > { %v806_v57 = vpop.f32.mrf.mxu0 }
 0x155   : > { %v919_v58 = vpop.f32.mrf.mxu1  ;;  %v807_v59 = vadd.f32 %v806_v57, %v2312_v53  ;;  %v918_v5 = vadd.f32 %v917_v56, %v805_v60 }
 0x156   : > { %v808_v61 = vpop.f32.mrf.mxu0 }
 0x157   : > { %v921_v62 = vpop.f32.mrf.mxu1  ;;  %v809_v63 = vadd.f32 %v808_v61, %v2314_v54  ;;  %v920_v2 = vadd.f32 %v919_v58, %v807_v59  ;;  %v996_v15 = vmax.f32 %v918_v5, 0.0 }
 0x158   : > { %v810_v0 = vpop.f32.mrf.mxu0 }
 0x159   : > { %v923_v1 = vpop.f32.mrf.mxu1  ;;  %v922_v3 = vadd.f32 %v921_v62, %v809_v63  ;;  %v811_v4 = vadd.f32 %v810_v0, %v2312_v53  ;;  %v997_v12 = vmax.f32 %v920_v2, 0.0 }
 0x15a   : > { %v814_v6 = vpop.f32.mrf.mxu0 }
 0x15b   : > { %v927_v7 = vpop.f32.mrf.mxu1  ;;  %v924_v8 = vadd.f32 %v923_v1, %v811_v4  ;;  %v998_v9 = vmax.f32 %v922_v3, 0.0  ;;  %v815_v16 = vadd.f32 %v814_v6, %v2314_v54 }
 0x15c   : > { %v816_v10 = vpop.f32.mrf.mxu0 }
 0x15d   : > { %v929_v11 = vpop.f32.mrf.mxu1  ;;  %v999_v13 = vmax.f32 %v924_v8, 0.0  ;;  %v817_v14 = vadd.f32 %v816_v10, %v2312_v53  ;;  %v1028_v21 = vpack.c.bf16 %v998_v9, %v996_v15  ;;  %v928_v27 = vadd.f32 %v927_v7, %v815_v16 }
 0x15e   : > { %v818_v17 = vpop.f32.mrf.mxu0 }
 0x15f   : > { %v931_v18 = vpop.f32.mrf.mxu1  ;;  %v1029_v19 = vpack.c.bf16 %v999_v13, %v997_v12  ;;  %v819_v20 = vadd.f32 %v818_v17, %v2314_v54  ;;  %v930_v24 = vadd.f32 %v929_v11, %v817_v14  ;;  %v1000_v37 = vmax.f32 %v928_v27, 0.0 }
 0x160   : > { %v820_v22 = vpop.f32.mrf.mxu0 }
 0x161   : > { %v933_v23 = vpop.f32.mrf.mxu1  ;;  %v932_v25 = vadd.f32 %v931_v18, %v819_v20  ;;  %v821_v26 = vadd.f32 %v820_v22, %v2312_v53  ;;  %1211 = vmatprep.mubr.bf16.mxu0 %v1029_v19  ;;  %v1001_v34 = vmax.f32 %v930_v24, 0.0 }
 0x162   : > { %v824_v28 = vpop.f32.mrf.mxu0  ;;  %1212 = vmatmul.mubr.bf16.vlgmr.msra.gmra.mxu0 %v1028_v21 }
 0x163   : > { %v937_v29 = vpop.f32.mrf.mxu1  ;;  %v934_v30 = vadd.f32 %v933_v23, %v821_v26  ;;  %v1002_v31 = vmax.f32 %v932_v25, 0.0  ;;  %v825_v38 = vadd.f32 %v824_v28, %v2314_v54 }
 0x164   : > { %v826_v32 = vpop.f32.mrf.mxu0 }
 0x165   : > { %v939_v33 = vpop.f32.mrf.mxu1  ;;  %v1003_v35 = vmax.f32 %v934_v30, 0.0  ;;  %v827_v36 = vadd.f32 %v826_v32, %v2312_v53  ;;  %v1030_v43 = vpack.c.bf16 %v1002_v31, %v1000_v37  ;;  %v938_v49 = vadd.f32 %v937_v29, %v825_v38 }
 0x166   : > { %v828_v39 = vpop.f32.mrf.mxu0 }
 0x167   : > { %v941_v40 = vpop.f32.mrf.mxu1  ;;  %v1031_v41 = vpack.c.bf16 %v1003_v35, %v1001_v34  ;;  %v829_v42 = vadd.f32 %v828_v39, %v2314_v54  ;;  %v940_v46 = vadd.f32 %v939_v33, %v827_v36  ;;  %v1004_v61 = vmax.f32 %v938_v49, 0.0 }
 0x168   : > { %v830_v44 = vpop.f32.mrf.mxu0 }
 0x169   : > { %v943_v45 = vpop.f32.mrf.mxu1  ;;  %v942_v47 = vadd.f32 %v941_v40, %v829_v42  ;;  %v831_v48 = vadd.f32 %v830_v44, %v2312_v53  ;;  %1219 = vmatprep.mubr.bf16.mxu0 %v1031_v41  ;;  %v1005_v58 = vmax.f32 %v940_v46, 0.0 }
 0x16a   : > { %v834_v50 = vpop.f32.mrf.mxu0  ;;  %1220 = vmatmul.mubr.bf16.gmra.mxu0 %v1030_v43 }
 0x16b   : > { %v947_v51 = vpop.f32.mrf.mxu1  ;;  %v944_v52 = vadd.f32 %v943_v45, %v831_v48  ;;  %v1006_v55 = vmax.f32 %v942_v47, 0.0  ;;  %v835_v62 = vadd.f32 %v834_v50, %v2314_v54 }
 0x16c   : > { %v836_v56 = vpop.f32.mrf.mxu0 }
 0x16d   : > { %v949_v57 = vpop.f32.mrf.mxu1  ;;  %v1007_v59 = vmax.f32 %v944_v52, 0.0  ;;  %v837_v60 = vadd.f32 %v836_v56, %v2312_v53  ;;  %v1032_v3 = vpack.c.bf16 %v1006_v55, %v1004_v61  ;;  %v948_v9 = vadd.f32 %v947_v51, %v835_v62 }
 0x16e   : > { %v838_v63 = vpop.f32.mrf.mxu0 }
 0x16f   : > { %v951_v0 = vpop.f32.mrf.mxu1  ;;  %v1033_v1 = vpack.c.bf16 %v1007_v59, %v1005_v58  ;;  %v839_v2 = vadd.f32 %v838_v63, %v2314_v54  ;;  %v950_v6 = vadd.f32 %v949_v57, %v837_v60  ;;  %v1008_v19 = vmax.f32 %v948_v9, 0.0 }
 0x170   : > { %v840_v4 = vpop.f32.mrf.mxu0 }
 0x171   : > { %v953_v5 = vpop.f32.mrf.mxu1  ;;  %v952_v7 = vadd.f32 %v951_v0, %v839_v2  ;;  %v841_v8 = vadd.f32 %v840_v4, %v2312_v53  ;;  %1227 = vmatprep.mubr.bf16.mxu0 %v1033_v1  ;;  %v1009_v16 = vmax.f32 %v950_v6, 0.0 }
 0x172   : > { %v844_v10 = vpop.f32.mrf.mxu0  ;;  %1228 = vmatmul.mubr.bf16.gmra.mxu0 %v1032_v3 }
 0x173   : > { %v957_v11 = vpop.f32.mrf.mxu1  ;;  %v954_v12 = vadd.f32 %v953_v5, %v841_v8  ;;  %v1010_v13 = vmax.f32 %v952_v7, 0.0  ;;  %v845_v20 = vadd.f32 %v844_v10, %v2314_v54 }
 0x174   : > { %v846_v14 = vpop.f32.mrf.mxu0 }
 0x175   : > { %v959_v15 = vpop.f32.mrf.mxu1  ;;  %v1011_v17 = vmax.f32 %v954_v12, 0.0  ;;  %v847_v18 = vadd.f32 %v846_v14, %v2312_v53  ;;  %v1034_v25 = vpack.c.bf16 %v1010_v13, %v1008_v19  ;;  %v958_v31 = vadd.f32 %v957_v11, %v845_v20 }
 0x176   : > { %v848_v21 = vpop.f32.mrf.mxu0 }
 0x177   : > { %v961_v22 = vpop.f32.mrf.mxu1  ;;  %v1035_v23 = vpack.c.bf16 %v1011_v17, %v1009_v16  ;;  %v849_v24 = vadd.f32 %v848_v21, %v2314_v54  ;;  %v960_v28 = vadd.f32 %v959_v15, %v847_v18  ;;  %v1012_v41 = vmax.f32 %v958_v31, 0.0 }
 0x178   : > { %v850_v26 = vpop.f32.mrf.mxu0 }
 0x179   : > { %v963_v27 = vpop.f32.mrf.mxu1  ;;  %v962_v29 = vadd.f32 %v961_v22, %v849_v24  ;;  %v851_v30 = vadd.f32 %v850_v26, %v2312_v53  ;;  %1235 = vmatprep.mubr.bf16.mxu0 %v1035_v23  ;;  %v1013_v38 = vmax.f32 %v960_v28, 0.0 }
 0x17a   : > { %v854_v32 = vpop.f32.mrf.mxu0  ;;  %1236 = vmatmul.mubr.bf16.gmra.mxu0 %v1034_v25 }
 0x17b   : > { %v967_v33 = vpop.f32.mrf.mxu1  ;;  %v964_v34 = vadd.f32 %v963_v27, %v851_v30  ;;  %v1014_v35 = vmax.f32 %v962_v29, 0.0  ;;  %v855_v42 = vadd.f32 %v854_v32, %v2314_v54 }
 0x17c   : > { %v856_v36 = vpop.f32.mrf.mxu0 }
 0x17d   : > { %v969_v37 = vpop.f32.mrf.mxu1  ;;  %v1015_v39 = vmax.f32 %v964_v34, 0.0  ;;  %v857_v40 = vadd.f32 %v856_v36, %v2312_v53  ;;  %v1036_v47 = vpack.c.bf16 %v1014_v35, %v1012_v41  ;;  %v968_v55 = vadd.f32 %v967_v33, %v855_v42 }
 0x17e   : > { %v858_v43 = vpop.f32.mrf.mxu0 }
 0x17f   : > { %v971_v44 = vpop.f32.mrf.mxu1  ;;  %v1037_v45 = vpack.c.bf16 %v1015_v39, %v1013_v38  ;;  %v859_v46 = vadd.f32 %v858_v43, %v2314_v54  ;;  %v970_v50 = vadd.f32 %v969_v37, %v857_v40  ;;  %v1016_v1 = vmax.f32 %v968_v55, 0.0 }
 0x180   : > { %v860_v48 = vpop.f32.mrf.mxu0 }
 0x181   : > { %v973_v49 = vpop.f32.mrf.mxu1  ;;  %v972_v51 = vadd.f32 %v971_v44, %v859_v46  ;;  %v861_v52 = vadd.f32 %v860_v48, %v2312_v53  ;;  %1243 = vmatprep.mubr.bf16.mxu1 %v1037_v45  ;;  %v1017_v62 = vmax.f32 %v970_v50, 0.0  ;;  %v2351_v44 = vld [vmem:[%s2553_s4] ss:$0 sm:$0xff] }
 0x182   : > { %v864_v56 = vpop.f32.mrf.mxu0  ;;  %1244 = vmatmul.mubr.bf16.vlgmr.msra.gmra.mxu1 %v1036_v47 }
 0x183   : > { %v977_v57 = vpop.f32.mrf.mxu1  ;;  %v974_v58 = vadd.f32 %v973_v49, %v861_v52  ;;  %v1018_v59 = vmax.f32 %v972_v51, 0.0  ;;  %v865_v2 = vadd.f32 %v864_v56, %v2314_v54 }
 0x184   : > { %v866_v60 = vpop.f32.mrf.mxu0 }
 0x185   : > { %v979_v61 = vpop.f32.mrf.mxu1  ;;  %v1019_v63 = vmax.f32 %v974_v58, 0.0  ;;  %v867_v0 = vadd.f32 %v866_v60, %v2312_v53  ;;  %v1038_v7 = vpack.c.bf16 %v1018_v59, %v1016_v1  ;;  %v978_v13 = vadd.f32 %v977_v57, %v865_v2 }
 0x186   : > { %v868_v3 = vpop.f32.mrf.mxu0 }
 0x187   : > { %v981_v4 = vpop.f32.mrf.mxu1  ;;  %v1039_v5 = vpack.c.bf16 %v1019_v63, %v1017_v62  ;;  %v869_v6 = vadd.f32 %v868_v3, %v2314_v54  ;;  %v980_v10 = vadd.f32 %v979_v61, %v867_v0  ;;  %v1020_v23 = vmax.f32 %v978_v13, 0.0 }
 0x188   : > { %v870_v8 = vpop.f32.mrf.mxu0 }
 0x189   : > { %v983_v9 = vpop.f32.mrf.mxu1  ;;  %v982_v11 = vadd.f32 %v981_v4, %v869_v6  ;;  %v871_v12 = vadd.f32 %v870_v8, %v2312_v53  ;;  %1251 = vmatprep.mubr.bf16.mxu1 %v1039_v5  ;;  %v1021_v20 = vmax.f32 %v980_v10, 0.0 }
 0x18a   : > { %v874_v14 = vpop.f32.mrf.mxu0  ;;  %1252 = vmatmul.mubr.bf16.gmra.mxu1 %v1038_v7 }
 0x18b   : > { %v987_v15 = vpop.f32.mrf.mxu1  ;;  %v984_v16 = vadd.f32 %v983_v9, %v871_v12  ;;  %v1022_v17 = vmax.f32 %v982_v11, 0.0  ;;  %v875_v24 = vadd.f32 %v874_v14, %v2314_v54 }
 0x18c   : > { %v876_v18 = vpop.f32.mrf.mxu0 }
 0x18d   : > { %v989_v19 = vpop.f32.mrf.mxu1  ;;  %v1023_v21 = vmax.f32 %v984_v16, 0.0  ;;  %v877_v22 = vadd.f32 %v876_v18, %v2312_v53  ;;  %v1040_v29 = vpack.c.bf16 %v1022_v17, %v1020_v23  ;;  %v988_v34 = vadd.f32 %v987_v15, %v875_v24 }
 0x18e   : > { %v878_v25 = vpop.f32.mrf.mxu0 }
 0x18f   : > { %v991_v26 = vpop.f32.mrf.mxu1  ;;  %v1041_v27 = vpack.c.bf16 %v1023_v21, %v1021_v20  ;;  %v879_v28 = vadd.f32 %v878_v25, %v2314_v54  ;;  %v990_v31 = vadd.f32 %v989_v19, %v877_v22  ;;  %v1024_v40 = vmax.f32 %v988_v34, 0.0 }
 0x190   : > { %v880_v30 = vpop.f32.mrf.mxu0 }
 0x191   : > { %v992_v32 = vadd.f32 %v991_v26, %v879_v28  ;;  %v881_v33 = vadd.f32 %v880_v30, %v2312_v53  ;;  %1259 = vmatprep.mubr.bf16.mxu1 %v1041_v27  ;;  %v993_v35 = vpop.f32.mrf.mxu1  ;;  %v1025_v38 = vmax.f32 %v990_v31, 0.0 }
 0x192   : > { %1260 = vmatmul.mubr.bf16.gmra.mxu1 %v1040_v29 }
 0x193   : > { %v994_v36 = vadd.f32 %v993_v35, %v881_v33  ;;  %v1026_v37 = vmax.f32 %v992_v32, 0.0 }
 0x195   : > { %v1027_v39 = vmax.f32 %v994_v36, 0.0  ;;  %v1042_v42 = vpack.c.bf16 %v1026_v37, %v1024_v40 }
 0x197   : > { %v1043_v41 = vpack.c.bf16 %v1027_v39, %v1025_v38 }
 0x199   : > { %1267 = vmatprep.mubr.bf16.mxu1 %v1043_v41 }
 0x19a   : > { %1268 = vmatmul.mubr.bf16.gmra.mxu1 %v1042_v42 }
 0x222   : > { %v1656_v54 = vpop.f32.mrf.mxu0 }
 0x224   : > { %v1657_v43 = vpop.f32.mrf.mxu0 }
 0x225   : > { %v1658_v53 = vadd.f32 %v1657_v43, %v1656_v54 }
 0x226   : > { %v1659_v45 = vpop.f32.mrf.mxu0 }
 0x227   : > { %v2354_v46 = vadd.f32 %v1658_v53, %v2351_v44 }
 0x228   : > { %v1660_v47 = vpop.f32.mrf.mxu0 }
 0x229   : > { %v1661_v48 = vadd.f32 %v1660_v47, %v1659_v45  ;;  %1276 = vmax.xlane.f32.xlu0 %v2354_v46 }
 0x22a   : > { %v1662_v49 = vpop.f32.mrf.mxu0 }
 0x22b   : > { %v2358_v50 = vadd.f32 %v1661_v48, %v2351_v44 }
 0x22c   : > { %v1663_v51 = vpop.f32.mrf.mxu0 }
 0x22d   : > { %v1664_v52 = vadd.f32 %v1663_v51, %v1662_v49  ;;  %1278 = vmax.xlane.f32.xlu0 %v2358_v50 }
 0x22e   : > { %v1665_v55 = vpop.f32.mrf.mxu0 }
 0x22f   : > { %v2362_v56 = vadd.f32 %v1664_v52, %v2351_v44 }
 0x230   : > { %v1666_v57 = vpop.f32.mrf.mxu0 }
 0x231   : > { %v1667_v58 = vadd.f32 %v1666_v57, %v1665_v55  ;;  %1280 = vmax.xlane.f32.xlu1 %v2362_v56 }
 0x232   : > { %v1668_v59 = vpop.f32.mrf.mxu0 }
 0x233   : > { %v2366_v60 = vadd.f32 %v1667_v58, %v2351_v44 }
 0x234   : > { %v1669_v61 = vpop.f32.mrf.mxu0 }
 0x235   : > { %v1670_v62 = vadd.f32 %v1669_v61, %v1668_v59  ;;  %1282 = vmax.xlane.f32.xlu1 %v2366_v60 }
 0x236   : > { %v1671_v63 = vpop.f32.mrf.mxu0 }
 0x237   : > { %v2370_v0 = vadd.f32 %v1670_v62, %v2351_v44 }
 0x238   : > { %v1672_v1 = vpop.f32.mrf.mxu0 }
 0x239   : > { %v1673_v2 = vadd.f32 %v1672_v1, %v1671_v63  ;;  %1284 = vmax.xlane.f32.xlu0 %v2370_v0 }
 0x23a   : > { %v1674_v3 = vpop.f32.mrf.mxu0 }
 0x23b   : > { %v2374_v4 = vadd.f32 %v1673_v2, %v2351_v44 }
 0x23c   : > { %v1675_v5 = vpop.f32.mrf.mxu0 }
 0x23d   : > { %v1676_v6 = vadd.f32 %v1675_v5, %v1674_v3  ;;  %1286 = vmax.xlane.f32.xlu1 %v2374_v4 }
 0x23e   : > { %v1677_v7 = vpop.f32.mrf.mxu0 }
 0x23f   : > { %v2378_v8 = vadd.f32 %v1676_v6, %v2351_v44 }
 0x240   : > { %v1678_v9 = vpop.f32.mrf.mxu0 }
 0x241   : > { %v1679_v10 = vadd.f32 %v1678_v9, %v1677_v7  ;;  %1288 = vmax.xlane.f32.xlu0 %v2378_v8 }
 0x242   : > { %v1680_v11 = vpop.f32.mrf.mxu1 }
 0x243   : > { %v2382_v12 = vadd.f32 %v1679_v10, %v2351_v44 }
 0x244   : > { %v1681_v13 = vpop.f32.mrf.mxu1 }
 0x245   : > { %v1682_v14 = vadd.f32 %v1681_v13, %v1680_v11  ;;  %1290 = vmax.xlane.f32.xlu1 %v2382_v12 }
 0x246   : > { %v1683_v15 = vpop.f32.mrf.mxu1 }
 0x247   : > { %v2386_v16 = vadd.f32 %v1682_v14, %v2351_v44 }
 0x248   : > { %v1684_v17 = vpop.f32.mrf.mxu1 }
 0x249   : > { %v1685_v18 = vadd.f32 %v1684_v17, %v1683_v15  ;;  %1292 = vmax.xlane.f32.xlu0 %v2386_v16 }
 0x24a   : > { %v1686_v19 = vpop.f32.mrf.mxu1 }
 0x24b   : > { %v2390_v20 = vadd.f32 %v1685_v18, %v2351_v44 }
 0x24c   : > { %v1687_v21 = vpop.f32.mrf.mxu1 }
 0x24d   : > { %v1688_v22 = vadd.f32 %v1687_v21, %v1686_v19  ;;  %1294 = vmax.xlane.f32.xlu1 %v2390_v20 }
 0x24e   : > { %v1689_v23 = vpop.f32.mrf.mxu1 }
 0x24f   : > { %v2394_v24 = vadd.f32 %v1688_v22, %v2351_v44 }
 0x250   : > { %v1690_v25 = vpop.f32.mrf.mxu1 }
 0x251   : > { %v1691_v26 = vadd.f32 %v1690_v25, %v1689_v23  ;;  %1296 = vmax.xlane.f32.xlu0 %v2394_v24 }
 0x252   : > { %v1692_v27 = vpop.f32.mrf.mxu1 }
 0x253   : > { %v2398_v28 = vadd.f32 %v1691_v26, %v2351_v44 }
 0x254   : > { %v1693_v29 = vpop.f32.mrf.mxu1 }
 0x255   : > { %v1694_v30 = vadd.f32 %v1693_v29, %v1692_v27  ;;  %1298 = vmax.xlane.f32.xlu1 %v2398_v28 }
 0x256   : > { %v1695_v31 = vpop.f32.mrf.mxu1 }
 0x257   : > { %v2402_v32 = vadd.f32 %v1694_v30, %v2351_v44 }
 0x258   : > { %v1696_v33 = vpop.f32.mrf.mxu1 }
 0x259   : > { %v1697_v34 = vadd.f32 %v1696_v33, %v1695_v31  ;;  %1300 = vmax.xlane.f32.xlu0 %v2402_v32 }
 0x25a   : > { %v1698_v35 = vpop.f32.mrf.mxu1 }
 0x25b   : > { %v2406_v36 = vadd.f32 %v1697_v34, %v2351_v44 }
 0x25c   : > { %v1699_v37 = vpop.f32.mrf.mxu1 }
 0x25d   : > { %v1700_v38 = vadd.f32 %v1699_v37, %v1698_v35  ;;  %1302 = vmax.xlane.f32.xlu1 %v2406_v36 }
 0x25e   : > { %v1701_v39 = vpop.f32.mrf.mxu1 }
 0x25f   : > { %v2410_v40 = vadd.f32 %v1700_v38, %v2351_v44 }
 0x260   : > { %v1702_v41 = vpop.f32.mrf.mxu1 }
 0x261   : > { %v1703_v42 = vadd.f32 %v1702_v41, %v1701_v39  ;;  %1304 = vmax.xlane.f32.xlu0 %v2410_v40 }
 0x263   : > { %v2414_v54 = vadd.f32 %v1703_v42, %v2351_v44 }
 0x265   : > { %1306 = vmax.xlane.f32.xlu1 %v2414_v54 }
 0x2b2   : > { %v1277_v43 = vpop.xlane.xlu0 %1276 }
 0x2b3   : > { %v2418_v53 = vsub.f32 %v2354_v46, %v1277_v43 }
 0x2b5   : > { %v1324_v45 = vmul.f32 1.442695, %v2418_v53 }
 0x2b6   : > { %v1279_v47 = vpop.xlane.xlu0 %1278 }
 0x2b7   : > { %1898 = vpow2.f32 %v1324_v45  ;;  %v2422_v48 = vsub.f32 %v2358_v50, %v1279_v47 }
 0x2b9   : > { %v1326_v49 = vmul.f32 1.442695, %v2422_v48 }
 0x2ba   : > { %v1281_v51 = vpop.xlane.xlu1 %1280 }
 0x2bb   : > { %1900 = vpow2.f32 %v1326_v49  ;;  %v2426_v44 = vsub.f32 %v2362_v56, %v1281_v51 }
 0x2bd   : > { %v1328_v52 = vmul.f32 1.442695, %v2426_v44 }
 0x2be   : > { %v1283_v55 = vpop.xlane.xlu1 %1282 }
 0x2bf   : > { %1902 = vpow2.f32 %v1328_v52  ;;  %v2430_v46 = vsub.f32 %v2366_v60, %v1283_v55 }
 0x2c1   : > { %v1330_v57 = vmul.f32 1.442695, %v2430_v46 }
 0x2c2   : > { %v1285_v58 = vpop.xlane.xlu0 %1284 }
 0x2c3   : > { %1904 = vpow2.f32 %v1330_v57  ;;  %v2434_v50 = vsub.f32 %v2370_v0, %v1285_v58 }
 0x2c4   : > { %v1899_v59 = vpop.eup %1898 }
 0x2c5   : > { %v1332_v61 = vmul.f32 1.442695, %v2434_v50  ;;  %1356 = vadd.xlane.f32.xlu0 %v1899_v59 }
 0x2c6   : > { %v1287_v56 = vpop.xlane.xlu1 %1286 }
 0x2c7   : > { %1906 = vpow2.f32 %v1332_v61  ;;  %v2438_v62 = vsub.f32 %v2374_v4, %v1287_v56 }
 0x2c8   : > { %v1901_v63 = vpop.eup %1900 }
 0x2c9   : > { %v1334_v60 = vmul.f32 1.442695, %v2438_v62  ;;  %1358 = vadd.xlane.f32.xlu1 %v1901_v63 }
 0x2ca   : > { %v1289_v1 = vpop.xlane.xlu0 %1288 }
 0x2cb   : > { %1908 = vpow2.f32 %v1334_v60  ;;  %v2442_v2 = vsub.f32 %v2378_v8, %v1289_v1 }
 0x2cc   : > { %v1903_v0 = vpop.eup %1902 }
 0x2cd   : > { %v1336_v3 = vmul.f32 1.442695, %v2442_v2  ;;  %1360 = vadd.xlane.f32.xlu0 %v1903_v0 }
 0x2ce   : > { %v1291_v5 = vpop.xlane.xlu1 %1290 }
 0x2cf   : > { %1910 = vpow2.f32 %v1336_v3  ;;  %v2446_v6 = vsub.f32 %v2382_v12, %v1291_v5 }
 0x2d0   : > { %v1905_v4 = vpop.eup %1904 }
 0x2d1   : > { %v1338_v7 = vmul.f32 1.442695, %v2446_v6  ;;  %1362 = vadd.xlane.f32.xlu1 %v1905_v4 }
 0x2d2   : > { %v1293_v9 = vpop.xlane.xlu0 %1292 }
 0x2d3   : > { %1912 = vpow2.f32 %v1338_v7  ;;  %v2450_v10 = vsub.f32 %v2386_v16, %v1293_v9 }
 0x2d4   : > { %v1907_v8 = vpop.eup %1906 }
 0x2d5   : > { %v1340_v11 = vmul.f32 1.442695, %v2450_v10  ;;  %1364 = vadd.xlane.f32.xlu0 %v1907_v8 }
 0x2d6   : > { %v1295_v13 = vpop.xlane.xlu1 %1294 }
 0x2d7   : > { %1914 = vpow2.f32 %v1340_v11  ;;  %v2454_v14 = vsub.f32 %v2390_v20, %v1295_v13 }
 0x2d8   : > { %v1909_v12 = vpop.eup %1908 }
 0x2d9   : > { %v1342_v15 = vmul.f32 1.442695, %v2454_v14  ;;  %1366 = vadd.xlane.f32.xlu1 %v1909_v12 }
 0x2da   : > { %v1297_v17 = vpop.xlane.xlu0 %1296 }
 0x2db   : > { %1916 = vpow2.f32 %v1342_v15  ;;  %v2458_v18 = vsub.f32 %v2394_v24, %v1297_v17 }
 0x2dc   : > { %v1911_v16 = vpop.eup %1910 }
 0x2dd   : > { %v1344_v19 = vmul.f32 1.442695, %v2458_v18  ;;  %1368 = vadd.xlane.f32.xlu0 %v1911_v16 }
 0x2de   : > { %v1299_v21 = vpop.xlane.xlu1 %1298 }
 0x2df   : > { %1918 = vpow2.f32 %v1344_v19  ;;  %v2462_v22 = vsub.f32 %v2398_v28, %v1299_v21 }
 0x2e0   : > { %v1913_v20 = vpop.eup %1912 }
 0x2e1   : > { %v1346_v23 = vmul.f32 1.442695, %v2462_v22  ;;  %1370 = vadd.xlane.f32.xlu1 %v1913_v20 }
 0x2e2   : > { %v1301_v25 = vpop.xlane.xlu0 %1300 }
 0x2e3   : > { %1920 = vpow2.f32 %v1346_v23  ;;  %v2466_v26 = vsub.f32 %v2402_v32, %v1301_v25 }
 0x2e4   : > { %v1915_v24 = vpop.eup %1914 }
 0x2e5   : > { %v1348_v27 = vmul.f32 1.442695, %v2466_v26  ;;  %1372 = vadd.xlane.f32.xlu0 %v1915_v24 }
 0x2e6   : > { %v1303_v29 = vpop.xlane.xlu1 %1302 }
 0x2e7   : > { %1922 = vpow2.f32 %v1348_v27  ;;  %v2470_v30 = vsub.f32 %v2406_v36, %v1303_v29 }
 0x2e8   : > { %v1917_v28 = vpop.eup %1916 }
 0x2e9   : > { %v1350_v31 = vmul.f32 1.442695, %v2470_v30  ;;  %1374 = vadd.xlane.f32.xlu1 %v1917_v28 }
 0x2ea   : > { %v1305_v33 = vpop.xlane.xlu0 %1304 }
 0x2eb   : > { %1924 = vpow2.f32 %v1350_v31  ;;  %v2474_v34 = vsub.f32 %v2410_v40, %v1305_v33 }
 0x2ec   : > { %v1919_v32 = vpop.eup %1918 }
 0x2ed   : > { %v1352_v35 = vmul.f32 1.442695, %v2474_v34  ;;  %1376 = vadd.xlane.f32.xlu0 %v1919_v32 }
 0x2ee   : > { %v1307_v37 = vpop.xlane.xlu1 %1306 }
 0x2ef   : > { %1926 = vpow2.f32 %v1352_v35  ;;  %v2478_v38 = vsub.f32 %v2414_v54, %v1307_v37 }
 0x2f0   : > { %v1921_v36 = vpop.eup %1920 }
 0x2f1   : > { %v1354_v39 = vmul.f32 1.442695, %v2478_v38  ;;  %1378 = vadd.xlane.f32.xlu1 %v1921_v36 }
 0x2f3   : > { %1928 = vpow2.f32 %v1354_v39 }
 0x2f4   : > { %v1923_v41 = vpop.eup %1922 }
 0x2f5   : > { %1380 = vadd.xlane.f32.xlu0 %v1923_v41 }
 0x2f8   : > { %v1925_v42 = vpop.eup %1924 }
 0x2f9   : > { %1382 = vadd.xlane.f32.xlu1 %v1925_v42 }
 0x2fc   : > { %v1927_v40 = vpop.eup %1926 }
 0x2fd   : > { %1384 = vadd.xlane.f32.xlu0 %v1927_v40 }
 0x300   : > { %v1929_v43 = vpop.eup %1928 }
 0x301   : > { %1386 = vadd.xlane.f32.xlu1 %v1929_v43 }
 0x34e   : > { %v1357_v45 = vpop.xlane.xlu0 %1356 }
 0x34f   : > { %1930 = vlog2.f32 %v1357_v45 }
 0x352   : > { %v1359_v47 = vpop.xlane.xlu1 %1358 }
 0x353   : > { %1932 = vlog2.f32 %v1359_v47 }
 0x356   : > { %v1361_v54 = vpop.xlane.xlu0 %1360 }
 0x357   : > { %1934 = vlog2.f32 %v1361_v54 }
 0x35a   : > { %v1363_v49 = vpop.xlane.xlu1 %1362 }
 0x35b   : > { %1936 = vlog2.f32 %v1363_v49 }
 0x35c   : > { %v1931_v51 = vpop.eup %1930 }
 0x35d   : > { %v1389_v52 = vmul.f32 0.6931472, %v1931_v51 }
 0x35e   : > { %v1365_v55 = vpop.xlane.xlu0 %1364 }
 0x35f   : > { %v1420_v57 = vsub.f32 %v2418_v53, %v1389_v52  ;;  %1938 = vlog2.f32 %v1365_v55 }
 0x360   : > { %v1933_v58 = vpop.eup %1932 }
 0x361   : > { %1437 = vst.msk [vmem:[%s2486_s18] sm:$0xff] %vm1436_vm0, %v1420_v57  ;;  %v1391_v59 = vmul.f32 0.6931472, %v1933_v58 }
 0x362   : > { %v1367_v61 = vpop.xlane.xlu1 %1366 }
 0x363   : > { %v1421_v56 = vsub.f32 %v2422_v48, %v1391_v59  ;;  %1940 = vlog2.f32 %v1367_v61 }
 0x364   : > { %v1935_v63 = vpop.eup %1934 }
 0x365   : > { %1438 = vst.msk [vmem:[%s2486_s18 + $0x8] sm:$0xff] %vm1436_vm0, %v1421_v56  ;;  %v1393_v60 = vmul.f32 0.6931472, %v1935_v63 }
 0x366   : > { %v1369_v1 = vpop.xlane.xlu0 %1368 }
 0x367   : > { %v1422_v0 = vsub.f32 %v2426_v44, %v1393_v60  ;;  %1942 = vlog2.f32 %v1369_v1 }
 0x368   : > { %v1937_v53 = vpop.eup %1936 }
 0x369   : > { %1439 = vst.msk [vmem:[%s2486_s18 + $0x10] sm:$0xff] %vm1436_vm0, %v1422_v0  ;;  %v1395_v3 = vmul.f32 0.6931472, %v1937_v53 }
 0x36a   : > { %v1371_v5 = vpop.xlane.xlu1 %1370 }
 0x36b   : > { %v1423_v4 = vsub.f32 %v2430_v46, %v1395_v3  ;;  %1944 = vlog2.f32 %v1371_v5 }
 0x36c   : > { %v1939_v48 = vpop.eup %1938 }
 0x36d   : > { %1440 = vst.msk [vmem:[%s2486_s18 + $0x18] sm:$0xff] %vm1436_vm0, %v1423_v4  ;;  %v1397_v7 = vmul.f32 0.6931472, %v1939_v48 }
 0x36e   : > { %v1373_v9 = vpop.xlane.xlu0 %1372 }
 0x36f   : > { %v1424_v8 = vsub.f32 %v2434_v50, %v1397_v7  ;;  %1946 = vlog2.f32 %v1373_v9 }
 0x370   : > { %v1941_v44 = vpop.eup %1940 }
 0x371   : > { %1441 = vst.msk [vmem:[%s2486_s18 + $0x20] sm:$0xff] %vm1436_vm0, %v1424_v8  ;;  %v1399_v11 = vmul.f32 0.6931472, %v1941_v44 }
 0x372   : > { %v1375_v13 = vpop.xlane.xlu1 %1374 }
 0x373   : > { %v1425_v12 = vsub.f32 %v2438_v62, %v1399_v11  ;;  %1948 = vlog2.f32 %v1375_v13 }
 0x374   : > { %v1943_v46 = vpop.eup %1942 }
 0x375   : > { %1442 = vst.msk [vmem:[%s2486_s18 + $0x28] sm:$0xff] %vm1436_vm0, %v1425_v12  ;;  %v1401_v15 = vmul.f32 0.6931472, %v1943_v46 }
 0x376   : > { %v1377_v17 = vpop.xlane.xlu0 %1376 }
 0x377   : > { %v1426_v16 = vsub.f32 %v2442_v2, %v1401_v15  ;;  %1950 = vlog2.f32 %v1377_v17 }
 0x378   : > { %v1945_v50 = vpop.eup %1944 }
 0x379   : > { %1443 = vst.msk [vmem:[%s2486_s18 + $0x30] sm:$0xff] %vm1436_vm0, %v1426_v16  ;;  %v1403_v19 = vmul.f32 0.6931472, %v1945_v50 }
 0x37a   : > { %v1379_v21 = vpop.xlane.xlu1 %1378 }
 0x37b   : > { %v1427_v20 = vsub.f32 %v2446_v6, %v1403_v19  ;;  %1952 = vlog2.f32 %v1379_v21 }
 0x37c   : > { %v1947_v62 = vpop.eup %1946 }
 0x37d   : > { %1444 = vst.msk [vmem:[%s2486_s18 + $0x38] sm:$0xff] %vm1436_vm0, %v1427_v20  ;;  %v1405_v23 = vmul.f32 0.6931472, %v1947_v62 }
 0x37e   : > { %v1381_v25 = vpop.xlane.xlu0 %1380 }
 0x37f   : > { %v1428_v24 = vsub.f32 %v2450_v10, %v1405_v23  ;;  %1954 = vlog2.f32 %v1381_v25 }
 0x380   : > { %v1949_v2 = vpop.eup %1948 }
 0x381   : > { %1445 = vst.msk [vmem:[%s2486_s18 + $0x40] sm:$0xff] %vm1436_vm0, %v1428_v24  ;;  %v1407_v27 = vmul.f32 0.6931472, %v1949_v2 }
 0x382   : > { %v1383_v29 = vpop.xlane.xlu1 %1382 }
 0x383   : > { %v1429_v28 = vsub.f32 %v2454_v14, %v1407_v27  ;;  %1956 = vlog2.f32 %v1383_v29 }
 0x384   : > { %v1951_v6 = vpop.eup %1950 }
 0x385   : > { %1446 = vst.msk [vmem:[%s2486_s18 + $0x48] sm:$0xff] %vm1436_vm0, %v1429_v28  ;;  %v1409_v31 = vmul.f32 0.6931472, %v1951_v6 }
 0x386   : > { %v1385_v33 = vpop.xlane.xlu0 %1384 }
 0x387   : > { %v1430_v32 = vsub.f32 %v2458_v18, %v1409_v31  ;;  %1958 = vlog2.f32 %v1385_v33 }
 0x388   : > { %v1953_v10 = vpop.eup %1952 }
 0x389   : > { %1447 = vst.msk [vmem:[%s2486_s18 + $0x50] sm:$0xff] %vm1436_vm0, %v1430_v32  ;;  %v1411_v35 = vmul.f32 0.6931472, %v1953_v10 }
 0x38a   : > { %v1387_v37 = vpop.xlane.xlu1 %1386 }
 0x38b   : > { %v1431_v36 = vsub.f32 %v2462_v22, %v1411_v35  ;;  %1960 = vlog2.f32 %v1387_v37 }
 0x38c   : > { %v1955_v14 = vpop.eup %1954 }
 0x38d   : > { %1448 = vst.msk [vmem:[%s2486_s18 + $0x58] sm:$0xff] %vm1436_vm0, %v1431_v36  ;;  %v1413_v39 = vmul.f32 0.6931472, %v1955_v14 }
 0x38f   : > { %v1432_v41 = vsub.f32 %v2466_v26, %v1413_v39 }
 0x390   : > { %v1957_v42 = vpop.eup %1956 }
 0x391   : > { %1449 = vst.msk [vmem:[%s2486_s18 + $0x60] sm:$0xff] %vm1436_vm0, %v1432_v41  ;;  %v1415_v18 = vmul.f32 0.6931472, %v1957_v42 }
 0x393   : > { %v1433_v40 = vsub.f32 %v2470_v30, %v1415_v18 }
 0x394   : > { %v1959_v43 = vpop.eup %1958 }
 0x395   : > { %1450 = vst.msk [vmem:[%s2486_s18 + $0x68] sm:$0xff] %vm1436_vm0, %v1433_v40  ;;  %v1417_v45 = vmul.f32 0.6931472, %v1959_v43 }
 0x397   : > { %v1434_v22 = vsub.f32 %v2474_v34, %v1417_v45 }
 0x398   : > { %v1961_v47 = vpop.eup %1960 }
 0x399   : > { %1451 = vst.msk [vmem:[%s2486_s18 + $0x70] sm:$0xff] %vm1436_vm0, %v1434_v22  ;;  %v1419_v54 = vmul.f32 0.6931472, %v1961_v47 }
 0x39b   : > { %v1435_v49 = vsub.f32 %v2478_v38, %v1419_v54 }
 0x39d   : > { %1452 = vst.msk [vmem:[%s2486_s18 + $0x78] sm:$0xff] %vm1436_vm0, %v1435_v49 }
 0x39e PF: > { %p16_p10 = scmp.ge.s32.totalorder %s2186_s16, 4   ;;  %s2567_s18 = smov %s2072_s19 }
 0x39f   : > { %s2568_s19 = smov %s2076_s20  ;;  %s2569_s20 = smov %s2195_s26 }
 0x3a0   : > { %s2570_s21 = smov %s2186_s16  ;;  %18 = sbr.rel (!%p16_p10) target bundleno = 4 (0x4), region = 88 }
 0x3a5   :  { %1475 = vsyncpa [#allocation3], 1 }
 0x3a6   :  { %1477 = vsyncpa [#allocation3 + $0x1], 1 }
 0x3a7   :  { %1478 = vsyncpa [#allocation5], 1 }

</bundles_post_ra>
